<compile_context>
chip_gen: v7x
topology: tpu7x:2x2x1
jax: 0.10.0
libtpu: 0.0.40
codegen_flags: <defaults>
</compile_context>

<pallas_src>
import jax
import jax.numpy as jnp
from jax import lax
from jax.experimental import pallas as pl
from jax.experimental.pallas import tpu as pltpu


def _double_linear_kernel(x_ref, w_ref, o_ref):
    # x: (TB, IN), w: (OUT, IN).  Contract the last dim of both operands
    # (== x @ W.T) without materializing a transpose in VMEM.
    y = lax.dot_general(
        x_ref[...],
        w_ref[...],
        dimension_numbers=(((1,), (1,)), ((), ())),
        preferred_element_type=jnp.float32,
    )  # (TB, OUT), f32
    # add(linear(x), linear(x)) fused as a scale; in/out dtypes are both f32.
    o_ref[...] = 2.0 * y


def double_value_forward(x, w, *, tb=512):
    """x: (B, IN) f32, w: (OUT, IN) f32 -> (B, OUT) f32 == 2 * (x @ w.T)."""
    B, IN = x.shape
    OUT = w.shape[0]
    out_shape = jax.ShapeDtypeStruct((B, OUT), x.dtype)

    if B <= tb:
        # Tiny problem: single block resident in VMEM, no grid / software
        # pipeline overhead (the ~600-cycle per-step bookkeeping would dwarf
        # the single vmatmul here).
        return pl.pallas_call(
            _double_linear_kernel,
            out_shape=out_shape,
            in_specs=[
                pl.BlockSpec(memory_space=pltpu.MemorySpace.VMEM),
                pl.BlockSpec(memory_space=pltpu.MemorySpace.VMEM),
            ],
            out_specs=pl.BlockSpec(memory_space=pltpu.MemorySpace.VMEM),
        )(x, w)

    # Throughput path: tile the batch so HBM<->VMEM DMAs double-buffer.
    # TB is a multiple of 8 (sublane) and small enough to stay well inside
    # v7x's 64 MiB VMEM (x + out blocks are ~TB*80 B each, double-buffered).
    grid = (pl.cdiv(B, tb),)
    return pl.pallas_call(
        _double_linear_kernel,
        out_shape=out_shape,
        grid=grid,
        in_specs=[
            pl.BlockSpec((tb, IN), lambda i: (i, 0)),
            # Weight is tiny and constant across the grid -> resident block.
            pl.BlockSpec((OUT, IN), lambda i: (0, 0)),
        ],
        out_specs=pl.BlockSpec((tb, OUT), lambda i: (i, 0)),
        compiler_params=pltpu.CompilerParams(
            # Batch axis is embarrassingly parallel: lets v7x shard grid
            # steps across both TensorCores (neutral on v5e/v6e).
            dimension_semantics=("parallel",),
        ),
    )(x, w)


if __name__ == "__main__":
    key = jax.random.PRNGKey(0)
    kx, kw, kx2 = jax.random.split(key, 3)

    IN, OUT = 10, 10
    # Deterministic init mimicking nn.Linear's uniform(-1/sqrt(in), 1/sqrt(in)).
    bound = 1.0 / jnp.sqrt(jnp.float32(IN))
    w = jax.random.uniform(kw, (OUT, IN), dtype=jnp.float32,
                           minval=-bound, maxval=bound)

    # Small-batch (single-block, no-grid) path.
    B_small = 8
    x_small = jax.random.normal(kx, (B_small, IN), dtype=jnp.float32)
    out_small = double_value_forward(x_small, w)
    jax.block_until_ready(out_small)
    ref_small = 2.0 * (x_small @ w.T)
    assert out_small.shape == (B_small, OUT)
    assert jnp.allclose(out_small, ref_small, atol=1e-5, rtol=1e-5)

    # Batch-tiled path (exercises the grid + resident-weight spec).
    B_big = 1024
    x_big = jax.random.normal(kx2, (B_big, IN), dtype=jnp.float32)
    out_big = double_value_forward(x_big, w, tb=512)
    jax.block_until_ready(out_big)
    ref_big = 2.0 * (x_big @ w.T)
    assert out_big.shape == (B_big, OUT)
    assert jnp.allclose(out_big, ref_big, atol=1e-5, rtol=1e-5)

    print("KERNEL_OK")
</pallas_src>

<mosaic_0001>
module attributes {stable_mosaic.version = 11 : i64} {
  func.func @_double_linear_kernel(%arg0: memref<8x10xf32, #tpu.memory_space<vmem>>, %arg1: memref<10x10xf32, #tpu.memory_space<vmem>>, %arg2: memref<8x10xf32, #tpu.memory_space<vmem>>) attributes {dimension_semantics = [], scalar_prefetch = 0 : i64, scratch_operands = 0 : i64, tpu.core_type = #tpu.core_type<tc>} {
    %c0 = arith.constant 0 : index
    %c0_0 = arith.constant 0 : index
    %0 = vector.load %arg0[%c0, %c0_0] : memref<8x10xf32, #tpu.memory_space<vmem>>, vector<8x10xf32>
    %c0_1 = arith.constant 0 : index
    %c0_2 = arith.constant 0 : index
    %1 = vector.load %arg1[%c0_1, %c0_2] : memref<10x10xf32, #tpu.memory_space<vmem>>, vector<10x10xf32>
    %cst = arith.constant dense<0.000000e+00> : vector<8x10xf32>
    %2 = tpu.matmul %0, %1, %cst {dimension_numbers = #tpu.dot_dimension_numbers<[1], [1], [0], [0], [0, 0, 1, 0], [], []>} : vector<8x10xf32>, vector<10x10xf32>, vector<8x10xf32> -> vector<8x10xf32>
    %cst_3 = arith.constant 2.000000e+00 : f32
    %3 = vector.broadcast %cst_3 : f32 to vector<8x10xf32>
    %4 = arith.mulf %3, %2 : vector<8x10xf32>
    %c0_4 = arith.constant 0 : index
    %c0_5 = arith.constant 0 : index
    %5 = vector.load %arg2[%c0_4, %c0_5] : memref<8x10xf32, #tpu.memory_space<vmem>>, vector<8x10xf32>
    tpu.vector_store %arg2[%c0_4, %c0_5], %4 {strides = array<i32>} : memref<8x10xf32, #tpu.memory_space<vmem>>, vector<8x10xf32>,
    return
  }
}

</mosaic_0001>

<bundles_post_ra>
// kernel: tpu_custom_call.1
= control target key start
LH: loop header
LB: loop body
LE: loop exit
PB: predicated region body
PF: predicated region fallthrough
CT: control target
= control target key end

     0   :  { %7 = vsyncpa [#allocation3], 0  ;;  %s302_s0 = inlined_call_operand.hbm [shape: f32[8,10], index: 0, kind: input, shape index: {}]   ;;  %s303_s1 = inlined_call_operand.hbm [shape: f32[10,10], index: 1, kind: input, shape index: {}]   ;;  %s304_s2 = inlined_call_operand.hbm [shape: f32[8,10], index: 2, kind: output, shape index: {}]  }
   0x1   :  { %8 = vsyncpa [#allocation6], 0 }
   0x2   :  { %9 = vsyncpa [#allocation4], 0  ;;  %s236_s9 = smov [#allocation2]   ;;  %s237_s11 = smov [#allocation5]  }
   0x3   :  { %s16_s10 = sshll.u32 %s236_s9, 4  ;;  %s25_s12 = sshll.u32 %s237_s11, 4  ;;  %s17_s10 = int_to_ptr.vmem [resolvable:$true] %s16_s10  ;;  %s259_s12 = int_to_ptr.vmem [resolvable:$true] %s25_s12 }
   0x4   :  { %s164_s15 = scalar_lea.hbm %s302_s0, 128 }
   0x5   :  { %p165_p0 = scmp.ne.s32.totalorder %s302_s0, %s164_s15  ;;  %p168_p1 = scmp.lt.u32.totalorder %s164_s15, %s302_s0 }
   0x7   :  { %p170_p2 = pnand %p168_p1, %p165_p0 }
   0x9   :  { %173 = shalt.err (!%p170_p2)
}
   0xa   :  { %s174_s20 = scalar_lea.vmem %s17_s10, 128  ;;  %p179_p4 = scmp.lt.s32.totalorder %s17_s10, %s17_s10 }
   0xb   :  { %p175_p3 = scmp.ne.s32.totalorder %s17_s10, %s174_s20  ;;  %p180_p5 = scmp.lt.s32.totalorder %s174_s20, %s174_s20 }
   0xd   :  { %p181_p6 = por %p180_p5, %p179_p4 }
   0xf   :  { %p182_p7 = pnand %p181_p6, %p175_p3 }
  0x11   :  { %185 = shalt.err (!%p182_p7)
}
  0x12   :  { %19 = dma.hbm_to_vmem [thread:$0]  %s302_s0, 128, %s17_s10, [#allocation3]  }
  0x13   :  { %s186_s25 = scalar_lea.hbm %s303_s1, 256 }
  0x14   :  { %p187_p8 = scmp.ne.s32.totalorder %s303_s1, %s186_s25  ;;  %p190_p9 = scmp.lt.u32.totalorder %s186_s25, %s303_s1 }
  0x16   :  { %p192_p10 = pnand %p190_p9, %p187_p8 }
  0x18   :  { %195 = shalt.err (!%p192_p10)
}
  0x19   :  { %s196_s30 = scalar_lea.vmem %s259_s12, 256  ;;  %p201_p12 = scmp.lt.s32.totalorder %s259_s12, %s259_s12 }
  0x1a   :  { %p197_p11 = scmp.ne.s32.totalorder %s259_s12, %s196_s30  ;;  %p202_p13 = scmp.lt.s32.totalorder %s196_s30, %s196_s30 }
  0x1c   :  { %p203_p0 = por %p202_p13, %p201_p12 }
  0x1e   :  { %p204_p1 = pnand %p203_p0, %p197_p11 }
  0x20   :  { %207 = shalt.err (!%p204_p1)
}
  0x21   :  { %s238_s0 = smov 128   ;;  %s239_s3 = smov 8  }
  0x22   :  { %31 = dma.hbm_to_vmem [thread:$0]  %s303_s1, 256, %s259_s12, [#allocation6], %s238_s0, %s238_s0, %s239_s3  }
  0x23   :  { %230 = dma.done.wait [#allocation3], 128  }
  0x24   :  { %231 = vsyncadd [#allocation3], 4294967168 }
  0x25   :  { %232 = dma.done.wait [#allocation6], 256  }
  0x26   :  { %233 = vsyncadd [#allocation6], 4294967040  ;;  %v240_v0 = vmov 0.0|0.0   ;;  %vm241_vm0 = vmmov 0   ;;  %v242_v1 = vmov 0.0   ;;  %vm41_vm1 = vcmask 80896  }
  0x27   :  { %152 = vmatprep.subr.bf16.mxu0 %v240_v0  ;;  %149 = vmatprep.mubr.msk.f32.mxu0 %vm241_vm0, %v242_v1  ;;  %v39_v2 = vld [vmem:[#allocation5] sm:$0xff]  ;;  %v40_v3 = vld [vmem:[#allocation5 + $0x8] sm:$0x3]  ;;  %vm154_vm2 = vmpackc.low %vm41_vm1, %vm41_vm1  ;;  %s243_s6 = smov [#allocation7]  }
  0x28   :  { %v153_v4 = vpack.c.bf16 %v40_v3, %v39_v2  ;;  %v38_v5 = vld [vmem:[#allocation2] sm:$0xff]  ;;  %s129_s7 = sshll.u32 %s243_s6, 4  ;;  %s130_s7 = int_to_ptr.vmem [resolvable:$true] %s129_s7 }
  0x29   :  { %s208_s1 = scalar_lea.vmem %s130_s7, 128  ;;  %p213_p3 = scmp.lt.s32.totalorder %s130_s7, %s130_s7 }
  0x2a   :  { %155 = vmatpush3.bf16.xpose.msk.msra.mxu0 %vm154_vm2, %v153_v4  ;;  %p209_p2 = scmp.ne.s32.totalorder %s130_s7, %s208_s1  ;;  %p214_p4 = scmp.lt.s32.totalorder %s208_s1, %s208_s1 }
  0x2c   :  { %p215_p5 = por %p214_p4, %p213_p3 }
  0x2e   :  { %p216_p6 = pnand %p215_p5, %p209_p2 }
  0x31   :  { %150 = vmatmul.mubr.msk.f32.vlgmr.msra.gmra.mrb[0].mxu0 %vm41_vm1, %v38_v5 }
 0x104   :  { %v117_v6 = vpop.f32.mrb[0].mxu0 }
 0x105   :  { %v121_v7 = vmul.f32 2.0, %v117_v6  ;;  %v151_v8 = vpop.f32.mrb[1].mxu0 }
 0x107   :  { %122 = vst.msk [vmem:[#allocation7] sm:$0xff] %vm41_vm1, %v121_v7 }
 0x108   :  { %219 = shalt.err (!%p216_p6)
}
 0x109   :  { %s220_s10 = scalar_lea.hbm %s304_s2, 128 }
 0x10a   :  { %p221_p7 = scmp.ne.s32.totalorder %s304_s2, %s220_s10  ;;  %p224_p8 = scmp.lt.u32.totalorder %s220_s10, %s304_s2 }
 0x10c   :  { %p226_p9 = pnand %p224_p8, %p221_p7 }
 0x10e   :  { %229 = shalt.err (!%p226_p9)
}
 0x10f   :  { %132 = dma.vmem_to_hbm [thread:$0]  %s130_s7, 128, %s304_s2, [#allocation4]  }
 0x110   :  { %234 = dma.done.wait [#allocation4], 128  }
 0x111   :  { %235 = vsyncadd [#allocation4], 4294967168 }
 0x112   :  { %136 = vsyncpa [#allocation3], 1 }
 0x113   :  { %137 = vsyncpa [#allocation6], 1 }
 0x114   :  { %138 = vsyncpa [#allocation4], 1 }

</bundles_post_ra>
